<compile_context>
chip_gen: v7x
topology: tpu7x:2x2x1
jax: 0.10.0
libtpu: 0.0.40
codegen_flags: <defaults>
</compile_context>

<pallas_src>
import functools

import jax
import jax.numpy as jnp
from jax import lax
from jax.experimental import pallas as pl
from jax.experimental.pallas import tpu as pltpu


def _round_up(x, m):
    return (x + m - 1) // m * m


def _choose_tn(n, tn_cap):
    """Lane tile: multiple of 128, >=2 tiles when possible (v7x megacore)."""
    n128 = _round_up(n, 128)
    if n128 >= 256:
        return min(tn_cap, _round_up(n128 // 2, 128))
    return n128


# ----------------------------------------------------------------------------
# Kernel 1: plain conv-as-matmul over im2col columns (batch folded into lanes)
#   out[o, n] = sum_ck w[o, ck] * cols[ck, n] + b[o]
# Grid = (N tiles [parallel], CK2 tiles [reduction, arbitrary, last]).
# The f32 output block is the accumulator (its index is constant over k).
# ----------------------------------------------------------------------------
def _conv_matmul_kernel(w_ref, b_ref, cols_ref, out_ref):
    k = pl.program_id(1)

    @pl.when(k == 0)
    def _():
        out_ref[...] = jnp.zeros_like(out_ref)

    out_ref[...] += jnp.dot(w_ref[...], cols_ref[...],
                            preferred_element_type=jnp.float32)

    @pl.when(k == pl.num_programs(1) - 1)
    def _():
        out_ref[...] += b_ref[...]


def conv_from_cols(weight2d, bias, cols, *, tn_cap=1024, tk_cap=512):
    """weight2d: (O, CK2), bias: (O,), cols: (CK2, N) -> (O, N) float32.

    N = B * H_out * W_out (batch folded into the lane axis).
    """
    O, CK2 = weight2d.shape
    CK2_c, N = cols.shape
    assert CK2_c == CK2

    Op = _round_up(O, 16)                    # bf16 sublane packing
    tn = _choose_tn(N, tn_cap)
    Np = _round_up(N, tn)
    if CK2 <= tk_cap:                        # whole reduction in one step
        tk = _round_up(CK2, 16)
        Kp = tk
    else:                                    # tile the reduction
        tk = 256
        Kp = _round_up(CK2, tk)

    w = jnp.pad(weight2d, ((0, Op - O), (0, Kp - CK2))).astype(jnp.bfloat16)
    b = jnp.pad(bias, (0, Op - O)).reshape(Op, 1).astype(jnp.float32)
    c = jnp.pad(cols, ((0, Kp - CK2), (0, Np - N))).astype(jnp.bfloat16)

    out = pl.pallas_call(
        _conv_matmul_kernel,
        out_shape=jax.ShapeDtypeStruct((Op, Np), jnp.float32),
        grid_spec=pltpu.PrefetchScalarGridSpec(
            num_scalar_prefetch=0,
            grid=(Np // tn, Kp // tk),
            in_specs=[
                pl.BlockSpec((Op, tk), lambda n, k: (0, k)),
                pl.BlockSpec((Op, 1), lambda n, k: (0, 0)),
                pl.BlockSpec((tk, tn), lambda n, k: (k, n)),
            ],
            out_specs=pl.BlockSpec((Op, tn), lambda n, k: (0, n)),
        ),
        compiler_params=pltpu.CompilerParams(
            dimension_semantics=("parallel", "arbitrary"),
        ),
    )(w, b, c)
    if Op != O or Np != N:
        out = out[:O, :N]
    return out


# ----------------------------------------------------------------------------
# Kernel 2: fused deformable conv: bilinear lerp + modulation + matmul.
# Grid = (N tiles [parallel], K2 taps [reduction, arbitrary, last]).
# Per step: c_tap[c,n] = sum_i w_i[n] * corner_i[c,n]  (bf16 VPU)
#           out       += W[k2] @ c_tap                 (MXU, f32 acc in out)
# dcols never touch HBM; only one tap's corner tiles are resident at a time.
# ----------------------------------------------------------------------------
def _deform_matmul_kernel(w_ref, b_ref, v00_ref, v01_ref, v10_ref, v11_ref,
                          w00_ref, w01_ref, w10_ref, w11_ref, out_ref):
    k2 = pl.program_id(1)

    @pl.when(k2 == 0)
    def _():
        out_ref[...] = jnp.zeros_like(out_ref)

    c_tap = (w00_ref[0] * v00_ref[0] + w01_ref[0] * v01_ref[0]
             + w10_ref[0] * v10_ref[0] + w11_ref[0] * v11_ref[0])   # bf16
    out_ref[...] += jnp.dot(w_ref[0], c_tap,
                            preferred_element_type=jnp.float32)

    @pl.when(k2 == pl.num_programs(1) - 1)
    def _():
        out_ref[...] += b_ref[...]


def deform_conv_from_corners(weight_kc, bias, corners, bweights, *, tn_cap=512):
    """weight_kc: (O, K2, C) f32; bias: (O,);
    corners: 4 x (K2, C, N) bf16; bweights: 4 x (K2, 1, N) bf16 (lerp * mod).
    Returns (O, N) f32."""
    O, K2, C = weight_kc.shape
    N = corners[0].shape[-1]
    Op = _round_up(O, 16)
    Cp = _round_up(C, 16)
    tn = _choose_tn(N, tn_cap)
    Np = _round_up(N, tn)

    w = weight_kc.transpose(1, 0, 2)                        # (K2, O, C)
    w = jnp.pad(w, ((0, 0), (0, Op - O), (0, Cp - C))).astype(jnp.bfloat16)
    b = jnp.pad(bias, (0, Op - O)).reshape(Op, 1).astype(jnp.float32)
    if Cp != C or Np != N:
        corners = [jnp.pad(v, ((0, 0), (0, Cp - C), (0, Np - N)))
                   for v in corners]
    if Np != N:
        bweights = [jnp.pad(m, ((0, 0), (0, 0), (0, Np - N)))
                    for m in bweights]
    corners = [v.astype(jnp.bfloat16) for v in corners]
    bweights = [m.astype(jnp.bfloat16) for m in bweights]

    out = pl.pallas_call(
        _deform_matmul_kernel,
        out_shape=jax.ShapeDtypeStruct((Op, Np), jnp.float32),
        grid_spec=pltpu.PrefetchScalarGridSpec(
            num_scalar_prefetch=0,
            grid=(Np // tn, K2),                 # reduction (taps) last
            in_specs=[
                pl.BlockSpec((1, Op, Cp), lambda n, k: (k, 0, 0)),
                pl.BlockSpec((Op, 1), lambda n, k: (0, 0)),
            ]
            + [pl.BlockSpec((1, Cp, tn), lambda n, k: (k, 0, n))] * 4
            + [pl.BlockSpec((1, 1, tn), lambda n, k: (k, 0, n))] * 4,
            out_specs=pl.BlockSpec((Op, tn), lambda n, k: (0, n)),
        ),
        compiler_params=pltpu.CompilerParams(
            dimension_semantics=("parallel", "arbitrary"),
        ),
    )(w, b, *corners, *bweights)
    if Op != O or Np != N:
        out = out[:O, :N]
    return out


# ----------------------------------------------------------------------------
# Glue: im2col with batch folded into the column (lane) axis.
# TODO(synk): fold im2col into the small-conv kernel via a (ky,kx) reduction
# grid axis over shifted windows of padded x instead of materializing cols.
# ----------------------------------------------------------------------------
def im2col(x, K, stride, pad):
    """(B,C,H,W) -> cols (C*K*K, B*Ho*Wo).  Row index = c*K*K + ky*K + kx."""
    B, C, H, W = x.shape
    sh, sw = stride
    Ho = (H + 2 * pad - K) // sh + 1
    Wo = (W + 2 * pad - K) // sw + 1
    xp = jnp.pad(x, ((0, 0), (0, 0), (pad, pad), (pad, pad)))
    patches = []
    for ky in range(K):
        for kx in range(K):
            patches.append(xp[:, :, ky:ky + sh * Ho:sh, kx:kx + sw * Wo:sw])
    cols = jnp.stack(patches, axis=2)              # (B, C, K2, Ho, Wo)
    cols = cols.transpose(1, 2, 0, 3, 4)           # (C, K2, B, Ho, Wo)
    return cols.reshape(C * K * K, B * Ho * Wo), Ho, Wo


# ----------------------------------------------------------------------------
# Glue: bilinear corner gather + modulated bilinear weights.
# TODO(synk): the per-output-pixel corner gather is data-dependent indexing
# with no clean BlockSpec / safe in-kernel gather expression; it stays in XLA
# (in bf16).  The lerp, modulation and matmul are fused in the Pallas kernel.
# ----------------------------------------------------------------------------
def deform_gather_corners(x, offset, mod, K, stride, pad, Ho, Wo):
    """x: (B,C,H,W) bf16; offset: (B,2K2,Ho,Wo) f32; mod: (K2, B*Ho*Wo) or None.
    Returns 4 corner arrays (K2,C,N) bf16 and 4 weight arrays (K2,1,N) bf16."""
    B, C, H, W = x.shape
    sh, sw = stride
    K2 = K * K
    L = Ho * Wo
    N = B * L

    # Offset channel layout (dy, dx) per kernel tap, matching
    # torchvision.ops.deform_conv2d.
    off = offset.reshape(B, K2, 2, Ho, Wo)
    off_y = off[:, :, 0]
    off_x = off[:, :, 1]

    k_idx = jnp.arange(K2)
    ky = (k_idx // K).astype(jnp.float32)
    kx = (k_idx % K).astype(jnp.float32)
    base_y = jnp.arange(Ho, dtype=jnp.float32) * sh - pad
    base_x = jnp.arange(Wo, dtype=jnp.float32) * sw - pad
    py = base_y[None, None, :, None] + ky[None, :, None, None] + off_y
    px = base_x[None, None, None, :] + kx[None, :, None, None] + off_x

    h0 = jnp.floor(py)
    w0 = jnp.floor(px)
    lh = py - h0
    lw = px - w0
    h0i = h0.astype(jnp.int32)
    w0i = w0.astype(jnp.int32)

    b_idx = jnp.arange(B).reshape(B, 1, 1, 1, 1)
    c_idx = jnp.arange(C).reshape(1, C, 1, 1, 1)

    def to_kcn(v):   # (B,C,K2,Ho,Wo) -> (K2, C, N)
        return v.transpose(2, 1, 0, 3, 4).reshape(K2, C, N)

    def gather(hi, wi):
        valid = (hi >= 0) & (hi < H) & (wi >= 0) & (wi < W)   # (B,K2,Ho,Wo)
        hc = jnp.clip(hi, 0, H - 1)
        wc = jnp.clip(wi, 0, W - 1)
        v = x[b_idx, c_idx, hc[:, None], wc[:, None]]          # (B,C,K2,Ho,Wo)
        return to_kcn(jnp.where(valid[:, None], v, 0.0))

    corners = (gather(h0i, w0i), gather(h0i, w0i + 1),
               gather(h0i + 1, w0i), gather(h0i + 1, w0i + 1))

    one = jnp.float32(1.0)
    wts = ((one - lh) * (one - lw), (one - lh) * lw,
           lh * (one - lw), lh * lw)

    def to_k1n(m):   # (B,K2,Ho,Wo) -> (K2, 1, N)
        return m.transpose(1, 0, 2, 3).reshape(K2, 1, N)

    wts = [to_k1n(w) for w in wts]
    if mod is not None:
        modk = mod.reshape(K2, 1, N)
        wts = [w * modk for w in wts]
    bweights = tuple(w.astype(jnp.bfloat16) for w in wts)
    return corners, bweights


# ----------------------------------------------------------------------------
# Plain-XLA reference for torchvision.ops.deform_conv2d (used for testing the
# Pallas path with non-zero offsets / modulation).
# ----------------------------------------------------------------------------
def deform_conv2d_reference(x, offset, mask, weight, stride, pad):
    B, C, H, W = x.shape
    O, _, K, _ = weight.shape
    sh, sw = stride
    Ho = (H + 2 * pad - K) // sh + 1
    Wo = (W + 2 * pad - K) // sw + 1
    K2 = K * K
    off = offset.reshape(B, K2, 2, Ho, Wo)
    ky = (jnp.arange(K2) // K).astype(jnp.float32)
    kx = (jnp.arange(K2) % K).astype(jnp.float32)
    py = ((jnp.arange(Ho, dtype=jnp.float32) * sh - pad)[None, None, :, None]
          + ky[None, :, None, None] + off[:, :, 0])
    px = ((jnp.arange(Wo, dtype=jnp.float32) * sw - pad)[None, None, None, :]
          + kx[None, :, None, None] + off[:, :, 1])
    h0 = jnp.floor(py)
    w0 = jnp.floor(px)
    lh = py - h0
    lw = px - w0
    h0 = h0.astype(jnp.int32)
    w0 = w0.astype(jnp.int32)
    b_idx = jnp.arange(B).reshape(B, 1, 1, 1, 1)
    c_idx = jnp.arange(C).reshape(1, C, 1, 1, 1)

    def sample(hi, wi):
        valid = (hi >= 0) & (hi < H) & (wi >= 0) & (wi < W)
        v = x[b_idx, c_idx, jnp.clip(hi, 0, H - 1)[:, None],
              jnp.clip(wi, 0, W - 1)[:, None]]
        return jnp.where(valid[:, None], v, 0.0)

    wts = [(1 - lh) * (1 - lw), (1 - lh) * lw, lh * (1 - lw), lh * lw]
    if mask is not None:
        wts = [w * mask for w in wts]
    vals = [sample(h0, w0), sample(h0, w0 + 1),
            sample(h0 + 1, w0), sample(h0 + 1, w0 + 1)]
    cols = sum(w[:, None] * v for w, v in zip(wts, vals))   # (B,C,K2,Ho,Wo)
    return jnp.einsum("ock,bckhw->bohw", weight.reshape(O, C, K2), cols)


# ----------------------------------------------------------------------------
# DeformableConv2d forward
# ----------------------------------------------------------------------------
def init_deformable_conv2d(key, in_channels, out_channels, kernel_size=3,
                           use_v2=False):
    K = kernel_size
    params = {}
    # offset_conv / modulator_conv: zero-initialized (as in the PyTorch module)
    params["offset_w"] = jnp.zeros((2 * K * K, in_channels, K, K), jnp.float32)
    params["offset_b"] = jnp.zeros((2 * K * K,), jnp.float32)
    if use_v2:
        params["mod_w"] = jnp.zeros((K * K, in_channels, K, K), jnp.float32)
        params["mod_b"] = jnp.zeros((K * K,), jnp.float32)
    # regular_conv: kaiming-uniform-like init, bias=False
    fan_in = in_channels * K * K
    bound = 1.0 / jnp.sqrt(jnp.float32(fan_in))
    params["reg_w"] = jax.random.uniform(
        key, (out_channels, in_channels, K, K), jnp.float32, -bound, bound)
    return params


def deformable_conv2d_forward(params, x, kernel_size=3, stride=(1, 1),
                              padding=1, use_v2=False):
    K = kernel_size
    K2 = K * K
    B, C, H, W = x.shape

    # HBM-bound pipeline: cast activations to bf16 up front so both im2col and
    # the corner gather stream half the bytes.
    x_bf = x.astype(jnp.bfloat16)

    # 1)+2) offset conv (and v2 modulation conv) fused into ONE Pallas matmul
    #       over shared im2col columns, batch folded into lanes.
    cols0, Ho, Wo = im2col(x_bf, K, stride, padding)       # (C*K2, B*L) bf16
    L = Ho * Wo
    N = B * L
    off_w2d = params["offset_w"].reshape(2 * K2, C * K2)
    if use_v2:
        mod_w2d = params["mod_w"].reshape(K2, C * K2)
        w_small = jnp.concatenate([off_w2d, mod_w2d], axis=0)   # (3K2, CK2)
        b_small = jnp.concatenate([params["offset_b"], params["mod_b"]])
    else:
        w_small = off_w2d
        b_small = params["offset_b"]
    small_out = conv_from_cols(w_small, b_small, cols0)         # (O_small, N)

    offset = small_out[:2 * K2].reshape(2 * K2, B, L).transpose(1, 0, 2)
    offset = offset.reshape(B, 2 * K2, Ho, Wo)
    if use_v2:
        mod = 2.0 * jax.nn.sigmoid(small_out[2 * K2:3 * K2])    # (K2, N)
    else:
        mod = None

    # 3) deformable conv: corner gather in XLA (bf16), bilinear lerp +
    #    modulation + matmul fused in the Pallas kernel with K2 as a
    #    pipelined reduction grid axis.
    corners, bweights = deform_gather_corners(
        x_bf, offset, mod, K, stride, padding, Ho, Wo)

    O = params["reg_w"].shape[0]
    w_kc = params["reg_w"].reshape(O, C, K2).transpose(0, 2, 1)  # (O, K2, C)
    reg_b = jnp.zeros((O,), jnp.float32)                         # bias=False
    out2d = deform_conv_from_corners(w_kc, reg_b, corners, bweights)  # (O, N)
    return out2d.reshape(O, B, L).transpose(1, 0, 2).reshape(B, O, Ho, Wo)


# ----------------------------------------------------------------------------
# main
# ----------------------------------------------------------------------------
if __name__ == "__main__":
    key = jax.random.PRNGKey(0)
    k_w, k_x, k_off, k_mod = jax.random.split(key, 4)

    B, C_in, H, W = 2, 4, 16, 16
    C_out, K = 8, 3
    stride, padding = (1, 1), 1
    K2 = K * K

    params = init_deformable_conv2d(k_w, C_in, C_out, K, use_v2=True)
    x = jax.random.normal(k_x, (B, C_in, H, W), jnp.float32)

    # Test 1: offset_conv / modulator_conv are zero-initialized, so the layer
    # must equal a regular conv with the same weights.  The Pallas path feeds
    # the MXU bf16 (f32 acc), so compare against a bf16-rounded reference.
    x_bf32 = x.astype(jnp.bfloat16).astype(jnp.float32)
    w_bf32 = params["reg_w"].astype(jnp.bfloat16).astype(jnp.float32)
    y_conv = lax.conv_general_dilated(
        x_bf32, w_bf32, window_strides=stride,
        padding=[(padding, padding), (padding, padding)],
        dimension_numbers=("NCHW", "OIHW", "NCHW"))

    for use_v2 in (False, True):
        fwd = jax.jit(functools.partial(
            deformable_conv2d_forward, kernel_size=K, stride=stride,
            padding=padding, use_v2=use_v2))
        y = fwd(params, x)
        jax.block_until_ready(y)
        assert y.shape == (B, C_out, H, W), y.shape
        assert jnp.allclose(y, y_conv, atol=2e-3, rtol=2e-3), (
            f"mismatch vs conv reference (use_v2={use_v2})")

    # Test 2: random offsets + modulation; fused Pallas deform path vs a
    # plain-XLA bilinear-sampling reference (validates gather/lerp/layout).
    Ho = (H + 2 * padding - K) // stride[0] + 1
    Wo = (W + 2 * padding - K) // stride[1] + 1
    offset = 2.0 * jax.random.normal(k_off, (B, 2 * K2, Ho, Wo), jnp.float32)
    mask = 2.0 * jax.nn.sigmoid(
        jax.random.normal(k_mod, (B, K2, Ho, Wo), jnp.float32))

    def deform_path(x, offset, mask, reg_w):
        mod_k2n = mask.transpose(1, 0, 2, 3).reshape(K2, B * Ho * Wo)
        corners, bweights = deform_gather_corners(
            x.astype(jnp.bfloat16), offset, mod_k2n, K, stride, padding,
            Ho, Wo)
        O = reg_w.shape[0]
        w_kc = reg_w.reshape(O, C_in, K2).transpose(0, 2, 1)
        out2d = deform_conv_from_corners(
            w_kc, jnp.zeros((O,), jnp.float32), corners, bweights)
        return out2d.reshape(O, B, Ho * Wo).transpose(1, 0, 2).reshape(
            B, O, Ho, Wo)

    y_def = jax.jit(deform_path)(x, offset, mask, params["reg_w"])
    y_def_ref = deform_conv2d_reference(x_bf32, offset, mask, w_bf32,
                                        stride, padding)
    jax.block_until_ready((y_def, y_def_ref))
    assert jnp.allclose(y_def, y_def_ref, atol=5e-2, rtol=5e-2), (
        "mismatch vs deform_conv2d reference (random offsets)")

    print("KERNEL_OK")
</pallas_src>

<mosaic_0001>
module attributes {stable_mosaic.version = 11 : i64} {
  func.func @_conv_matmul_kernel(%arg0: i32, %arg1: i32, %arg2: memref<32x48xbf16, #tpu.memory_space<vmem>>, %arg3: memref<32x1xf32, #tpu.memory_space<vmem>>, %arg4: memref<48x256xbf16, #tpu.memory_space<vmem>>, %arg5: memref<32x256xf32, #tpu.memory_space<vmem>>) attributes {dimension_semantics = [#tpu.dimension_semantics<parallel>, #tpu.dimension_semantics<arbitrary>], iteration_bounds = array<i64: 2, 1>, scalar_prefetch = 0 : i64, scratch_operands = 0 : i64, tpu.core_type = #tpu.core_type<tc>, window_params = [{transform_indices = @transform_0, window_bounds = array<i64: 32, 48>}, {pipeline_mode = #tpu.pipeline_mode<synchronous>, transform_indices = @transform_1, window_bounds = array<i64: 32, 1>}, {transform_indices = @transform_2, window_bounds = array<i64: 48, 256>}, {transform_indices = @transform_3, window_bounds = array<i64: 32, 256>}]} {
    %c0_i32 = arith.constant 0 : i32
    %0 = arith.cmpi eq, %arg1, %c0_i32 : i32
    %1 = arith.extui %0 : i1 to i32
    %c0_i32_0 = arith.constant 0 : i32
    %2 = arith.cmpi ne, %1, %c0_i32_0 : i32
    scf.if %2 {
      %cst_10 = arith.constant 0.000000e+00 : f32
      %12 = vector.broadcast %cst_10 : f32 to vector<32x256xf32>
      %c0_11 = arith.constant 0 : index
      %c0_12 = arith.constant 0 : index
      %13 = vector.load %arg5[%c0_11, %c0_12] : memref<32x256xf32, #tpu.memory_space<vmem>>, vector<32x256xf32>
      tpu.vector_store %arg5[%c0_11, %c0_12], %12 {strides = array<i32>} : memref<32x256xf32, #tpu.memory_space<vmem>>, vector<32x256xf32>,
    } else {
    }
    %c0 = arith.constant 0 : index
    %c0_1 = arith.constant 0 : index
    %3 = vector.load %arg5[%c0, %c0_1] : memref<32x256xf32, #tpu.memory_space<vmem>>, vector<32x256xf32>
    %c0_2 = arith.constant 0 : index
    %c0_3 = arith.constant 0 : index
    %4 = vector.load %arg2[%c0_2, %c0_3] : memref<32x48xbf16, #tpu.memory_space<vmem>>, vector<32x48xbf16>
    %c0_4 = arith.constant 0 : index
    %c0_5 = arith.constant 0 : index
    %5 = vector.load %arg4[%c0_4, %c0_5] : memref<48x256xbf16, #tpu.memory_space<vmem>>, vector<48x256xbf16>
    %cst = arith.constant dense<0.000000e+00> : vector<32x256xf32>
    %6 = tpu.matmul %4, %5, %cst {dimension_numbers = #tpu.dot_dimension_numbers<[1], [0], [0], [1], [0, 0, 1, 1], [], []>} : vector<32x48xbf16>, vector<48x256xbf16>, vector<32x256xf32> -> vector<32x256xf32>
    %7 = arith.addf %3, %6 : vector<32x256xf32>
    %c0_6 = arith.constant 0 : index
    %c0_7 = arith.constant 0 : index
    %8 = vector.load %arg5[%c0_6, %c0_7] : memref<32x256xf32, #tpu.memory_space<vmem>>, vector<32x256xf32>
    tpu.vector_store %arg5[%c0_6, %c0_7], %7 {strides = array<i32>} : memref<32x256xf32, #tpu.memory_space<vmem>>, vector<32x256xf32>,
    %c0_i32_8 = arith.constant 0 : i32
    %9 = arith.cmpi eq, %arg1, %c0_i32_8 : i32
    %10 = arith.extui %9 : i1 to i32
    %c0_i32_9 = arith.constant 0 : i32
    %11 = arith.cmpi ne, %10, %c0_i32_9 : i32
    scf.if %11 {
      %c0_10 = arith.constant 0 : index
      %c0_11 = arith.constant 0 : index
      %12 = vector.load %arg5[%c0_10, %c0_11] : memref<32x256xf32, #tpu.memory_space<vmem>>, vector<32x256xf32>
      %c0_12 = arith.constant 0 : index
      %c0_13 = arith.constant 0 : index
      %13 = vector.load %arg3[%c0_12, %c0_13] : memref<32x1xf32, #tpu.memory_space<vmem>>, vector<32x1xf32>
      %14 = vector.broadcast %13 : vector<32x1xf32> to vector<32x256xf32>
      %15 = arith.addf %12, %14 : vector<32x256xf32>
      %c0_14 = arith.constant 0 : index
      %c0_15 = arith.constant 0 : index
      %16 = vector.load %arg5[%c0_14, %c0_15] : memref<32x256xf32, #tpu.memory_space<vmem>>, vector<32x256xf32>
      tpu.vector_store %arg5[%c0_14, %c0_15], %15 {strides = array<i32>} : memref<32x256xf32, #tpu.memory_space<vmem>>, vector<32x256xf32>,
    } else {
    }
    return
  }
  func.func @transform_0(%arg0: i32, %arg1: i32) -> (i32, i32) {
    %c0_i32 = arith.constant 0 : i32
    %c0_i32_0 = arith.constant 0 : i32
    return %c0_i32, %arg1 : i32, i32
  }
  func.func @transform_1(%arg0: i32, %arg1: i32) -> (i32, i32) {
    %c0_i32 = arith.constant 0 : i32
    %c0_i32_0 = arith.constant 0 : i32
    %c0_i32_1 = arith.constant 0 : i32
    return %c0_i32, %c0_i32_0 : i32, i32
  }
  func.func @transform_2(%arg0: i32, %arg1: i32) -> (i32, i32) {
    %c0_i32 = arith.constant 0 : i32
    return %arg1, %arg0 : i32, i32
  }
  func.func @transform_3(%arg0: i32, %arg1: i32) -> (i32, i32) {
    %c0_i32 = arith.constant 0 : i32
    %c0_i32_0 = arith.constant 0 : i32
    return %c0_i32, %arg0 : i32, i32
  }
}

module attributes {stable_mosaic.version = 11 : i64} {
  func.func @_deform_matmul_kernel(%arg0: i32, %arg1: i32, %arg2: memref<1x16x16xbf16, #tpu.memory_space<vmem>>, %arg3: memref<16x1xf32, #tpu.memory_space<vmem>>, %arg4: memref<1x16x256xbf16, #tpu.memory_space<vmem>>, %arg5: memref<1x16x256xbf16, #tpu.memory_space<vmem>>, %arg6: memref<1x16x256xbf16, #tpu.memory_space<vmem>>, %arg7: memref<1x16x256xbf16, #tpu.memory_space<vmem>>, %arg8: memref<1x1x256xbf16, #tpu.memory_space<vmem>>, %arg9: memref<1x1x256xbf16, #tpu.memory_space<vmem>>, %arg10: memref<1x1x256xbf16, #tpu.memory_space<vmem>>, %arg11: memref<1x1x256xbf16, #tpu.memory_space<vmem>>, %arg12: memref<16x256xf32, #tpu.memory_space<vmem>>) attributes {dimension_semantics = [#tpu.dimension_semantics<parallel>, #tpu.dimension_semantics<arbitrary>], iteration_bounds = array<i64: 2, 9>, scalar_prefetch = 0 : i64, scratch_operands = 0 : i64, tpu.core_type = #tpu.core_type<tc>, window_params = [{transform_indices = @transform_0, window_bounds = array<i64: 1, 16, 16>}, {pipeline_mode = #tpu.pipeline_mode<synchronous>, transform_indices = @transform_1, window_bounds = array<i64: 16, 1>}, {transform_indices = @transform_2, window_bounds = array<i64: 1, 16, 256>}, {transform_indices = @transform_3, window_bounds = array<i64: 1, 16, 256>}, {transform_indices = @transform_4, window_bounds = array<i64: 1, 16, 256>}, {transform_indices = @transform_5, window_bounds = array<i64: 1, 16, 256>}, {transform_indices = @transform_6, window_bounds = array<i64: 1, 1, 256>}, {transform_indices = @transform_7, window_bounds = array<i64: 1, 1, 256>}, {transform_indices = @transform_8, window_bounds = array<i64: 1, 1, 256>}, {transform_indices = @transform_9, window_bounds = array<i64: 1, 1, 256>}, {transform_indices = @transform_10, window_bounds = array<i64: 16, 256>}]} {
    %c0_i32 = arith.constant 0 : i32
    %0 = arith.cmpi eq, %arg1, %c0_i32 : i32
    %1 = arith.extui %0 : i1 to i32
    %c0_i32_0 = arith.constant 0 : i32
    %2 = arith.cmpi ne, %1, %c0_i32_0 : i32
    scf.if %2 {
      %cst_32 = arith.constant 0.000000e+00 : f32
      %39 = vector.broadcast %cst_32 : f32 to vector<16x256xf32>
      %c0_33 = arith.constant 0 : index
      %c0_34 = arith.constant 0 : index
      %40 = vector.load %arg12[%c0_33, %c0_34] : memref<16x256xf32, #tpu.memory_space<vmem>>, vector<16x256xf32>
      tpu.vector_store %arg12[%c0_33, %c0_34], %39 {strides = array<i32>} : memref<16x256xf32, #tpu.memory_space<vmem>>, vector<16x256xf32>,
    } else {
    }
    %c0 = arith.constant 0 : index
    %c0_1 = arith.constant 0 : index
    %c0_2 = arith.constant 0 : index
    %3 = vector.load %arg8[%c0, %c0_1, %c0_2] : memref<1x1x256xbf16, #tpu.memory_space<vmem>>, vector<1x1x256xbf16>
    %4 = vector.shape_cast %3 : vector<1x1x256xbf16> to vector<1x256xbf16>
    %c0_3 = arith.constant 0 : index
    %c0_4 = arith.constant 0 : index
    %c0_5 = arith.constant 0 : index
    %5 = vector.load %arg4[%c0_3, %c0_4, %c0_5] : memref<1x16x256xbf16, #tpu.memory_space<vmem>>, vector<1x16x256xbf16>
    %6 = vector.shape_cast %5 : vector<1x16x256xbf16> to vector<16x256xbf16>
    %7 = vector.broadcast %4 : vector<1x256xbf16> to vector<16x256xbf16>
    %8 = arith.mulf %7, %6 : vector<16x256xbf16>
    %c0_6 = arith.constant 0 : index
    %c0_7 = arith.constant 0 : index
    %c0_8 = arith.constant 0 : index
    %9 = vector.load %arg9[%c0_6, %c0_7, %c0_8] : memref<1x1x256xbf16, #tpu.memory_space<vmem>>, vector<1x1x256xbf16>
    %10 = vector.shape_cast %9 : vector<1x1x256xbf16> to vector<1x256xbf16>
    %c0_9 = arith.constant 0 : index
    %c0_10 = arith.constant 0 : index
    %c0_11 = arith.constant 0 : index
    %11 = vector.load %arg5[%c0_9, %c0_10, %c0_11] : memref<1x16x256xbf16, #tpu.memory_space<vmem>>, vector<1x16x256xbf16>
    %12 = vector.shape_cast %11 : vector<1x16x256xbf16> to vector<16x256xbf16>
    %13 = vector.broadcast %10 : vector<1x256xbf16> to vector<16x256xbf16>
    %14 = arith.mulf %13, %12 : vector<16x256xbf16>
    %15 = arith.addf %8, %14 : vector<16x256xbf16>
    %c0_12 = arith.constant 0 : index
    %c0_13 = arith.constant 0 : index
    %c0_14 = arith.constant 0 : index
    %16 = vector.load %arg10[%c0_12, %c0_13, %c0_14] : memref<1x1x256xbf16, #tpu.memory_space<vmem>>, vector<1x1x256xbf16>
    %17 = vector.shape_cast %16 : vector<1x1x256xbf16> to vector<1x256xbf16>
    %c0_15 = arith.constant 0 : index
    %c0_16 = arith.constant 0 : index
    %c0_17 = arith.constant 0 : index
    %18 = vector.load %arg6[%c0_15, %c0_16, %c0_17] : memref<1x16x256xbf16, #tpu.memory_space<vmem>>, vector<1x16x256xbf16>
    %19 = vector.shape_cast %18 : vector<1x16x256xbf16> to vector<16x256xbf16>
    %20 = vector.broadcast %17 : vector<1x256xbf16> to vector<16x256xbf16>
    %21 = arith.mulf %20, %19 : vector<16x256xbf16>
    %22 = arith.addf %15, %21 : vector<16x256xbf16>
    %c0_18 = arith.constant 0 : index
    %c0_19 = arith.constant 0 : index
    %c0_20 = arith.constant 0 : index
    %23 = vector.load %arg11[%c0_18, %c0_19, %c0_20] : memref<1x1x256xbf16, #tpu.memory_space<vmem>>, vector<1x1x256xbf16>
    %24 = vector.shape_cast %23 : vector<1x1x256xbf16> to vector<1x256xbf16>
    %c0_21 = arith.constant 0 : index
    %c0_22 = arith.constant 0 : index
    %c0_23 = arith.constant 0 : index
    %25 = vector.load %arg7[%c0_21, %c0_22, %c0_23] : memref<1x16x256xbf16, #tpu.memory_space<vmem>>, vector<1x16x256xbf16>
    %26 = vector.shape_cast %25 : vector<1x16x256xbf16> to vector<16x256xbf16>
    %27 = vector.broadcast %24 : vector<1x256xbf16> to vector<16x256xbf16>
    %28 = arith.mulf %27, %26 : vector<16x256xbf16>
    %29 = arith.addf %22, %28 : vector<16x256xbf16>
    %c0_24 = arith.constant 0 : index
    %c0_25 = arith.constant 0 : index
    %30 = vector.load %arg12[%c0_24, %c0_25] : memref<16x256xf32, #tpu.memory_space<vmem>>, vector<16x256xf32>
    %c0_26 = arith.constant 0 : index
    %c0_27 = arith.constant 0 : index
    %c0_28 = arith.constant 0 : index
    %31 = vector.load %arg2[%c0_26, %c0_27, %c0_28] : memref<1x16x16xbf16, #tpu.memory_space<vmem>>, vector<1x16x16xbf16>
    %32 = vector.shape_cast %31 : vector<1x16x16xbf16> to vector<16x16xbf16>
    %cst = arith.constant dense<0.000000e+00> : vector<16x256xf32>
    %33 = tpu.matmul %32, %29, %cst {dimension_numbers = #tpu.dot_dimension_numbers<[1], [0], [0], [1], [0, 0, 1, 1], [], []>} : vector<16x16xbf16>, vector<16x256xbf16>, vector<16x256xf32> -> vector<16x256xf32>
    %34 = arith.addf %30, %33 : vector<16x256xf32>
    %c0_29 = arith.constant 0 : index
    %c0_30 = arith.constant 0 : index
    %35 = vector.load %arg12[%c0_29, %c0_30] : memref<16x256xf32, #tpu.memory_space<vmem>>, vector<16x256xf32>
    tpu.vector_store %arg12[%c0_29, %c0_30], %34 {strides = array<i32>} : memref<16x256xf32, #tpu.memory_space<vmem>>, vector<16x256xf32>,
    %c8_i32 = arith.constant 8 : i32
    %36 = arith.cmpi eq, %arg1, %c8_i32 : i32
    %37 = arith.extui %36 : i1 to i32
    %c0_i32_31 = arith.constant 0 : i32
    %38 = arith.cmpi ne, %37, %c0_i32_31 : i32
    scf.if %38 {
      %c0_32 = arith.constant 0 : index
      %c0_33 = arith.constant 0 : index
      %39 = vector.load %arg12[%c0_32, %c0_33] : memref<16x256xf32, #tpu.memory_space<vmem>>, vector<16x256xf32>
      %c0_34 = arith.constant 0 : index
      %c0_35 = arith.constant 0 : index
      %40 = vector.load %arg3[%c0_34, %c0_35] : memref<16x1xf32, #tpu.memory_space<vmem>>, vector<16x1xf32>
      %41 = vector.broadcast %40 : vector<16x1xf32> to vector<16x256xf32>
      %42 = arith.addf %39, %41 : vector<16x256xf32>
      %c0_36 = arith.constant 0 : index
      %c0_37 = arith.constant 0 : index
      %43 = vector.load %arg12[%c0_36, %c0_37] : memref<16x256xf32, #tpu.memory_space<vmem>>, vector<16x256xf32>
      tpu.vector_store %arg12[%c0_36, %c0_37], %42 {strides = array<i32>} : memref<16x256xf32, #tpu.memory_space<vmem>>, vector<16x256xf32>,
    } else {
    }
    return
  }
  func.func @transform_0(%arg0: i32, %arg1: i32) -> (i32, i32, i32) {
    %c0_i32 = arith.constant 0 : i32
    %c0_i32_0 = arith.constant 0 : i32
    %c0_i32_1 = arith.constant 0 : i32
    return %arg1, %c0_i32, %c0_i32_0 : i32, i32, i32
  }
  func.func @transform_1(%arg0: i32, %arg1: i32) -> (i32, i32) {
    %c0_i32 = arith.constant 0 : i32
    %c0_i32_0 = arith.constant 0 : i32
    %c0_i32_1 = arith.constant 0 : i32
    return %c0_i32, %c0_i32_0 : i32, i32
  }
  func.func @transform_2(%arg0: i32, %arg1: i32) -> (i32, i32, i32) {
    %c0_i32 = arith.constant 0 : i32
    %c0_i32_0 = arith.constant 0 : i32
    return %arg1, %c0_i32, %arg0 : i32, i32, i32
  }
  func.func @transform_3(%arg0: i32, %arg1: i32) -> (i32, i32, i32) {
    %c0_i32 = arith.constant 0 : i32
    %c0_i32_0 = arith.constant 0 : i32
    return %arg1, %c0_i32, %arg0 : i32, i32, i32
  }
  func.func @transform_4(%arg0: i32, %arg1: i32) -> (i32, i32, i32) {
    %c0_i32 = arith.constant 0 : i32
    %c0_i32_0 = arith.constant 0 : i32
    return %arg1, %c0_i32, %arg0 : i32, i32, i32
  }
  func.func @transform_5(%arg0: i32, %arg1: i32) -> (i32, i32, i32) {
    %c0_i32 = arith.constant 0 : i32
    %c0_i32_0 = arith.constant 0 : i32
    return %arg1, %c0_i32, %arg0 : i32, i32, i32
  }
  func.func @transform_6(%arg0: i32, %arg1: i32) -> (i32, i32, i32) {
    %c0_i32 = arith.constant 0 : i32
    %c0_i32_0 = arith.constant 0 : i32
    return %arg1, %c0_i32, %arg0 : i32, i32, i32
  }
  func.func @transform_7(%arg0: i32, %arg1: i32) -> (i32, i32, i32) {
    %c0_i32 = arith.constant 0 : i32
    %c0_i32_0 = arith.constant 0 : i32
    return %arg1, %c0_i32, %arg0 : i32, i32, i32
  }
  func.func @transform_8(%arg0: i32, %arg1: i32) -> (i32, i32, i32) {
    %c0_i32 = arith.constant 0 : i32
    %c0_i32_0 = arith.constant 0 : i32
    return %arg1, %c0_i32, %arg0 : i32, i32, i32
  }
  func.func @transform_9(%arg0: i32, %arg1: i32) -> (i32, i32, i32) {
    %c0_i32 = arith.constant 0 : i32
    %c0_i32_0 = arith.constant 0 : i32
    return %arg1, %c0_i32, %arg0 : i32, i32, i32
  }
  func.func @transform_10(%arg0: i32, %arg1: i32) -> (i32, i32) {
    %c0_i32 = arith.constant 0 : i32
    %c0_i32_0 = arith.constant 0 : i32
    return %c0_i32, %arg0 : i32, i32
  }
}

</mosaic_0001>

<bundles_post_ra>
// kernel: deformable_conv2d_forward.2
= control target key start
LH: loop header
LB: loop body
LE: loop exit
PB: predicated region body
PF: predicated region fallthrough
CT: control target
= control target key end

     0   :  { %s729_s12 = smov 0   ;;  %s731_s13 = smov 0   ;;  %s823_s0 = inlined_call_operand.vmem [shape: bf16[32,48], index: 0, kind: input, shape index: {}]   ;;  %s824_s1 = inlined_call_operand.vmem [shape: f32[32,1], index: 1, kind: input, shape index: {}]   ;;  %s825_s2 = inlined_call_operand.vmem [shape: bf16[48,512], index: 2, kind: input, shape index: {}]   ;;  %s826_s3 = inlined_call_operand.vmem [shape: f32[32,512], index: 3, kind: output, shape index: {}]  }
   0x1   :  { %s733_s14 = smov 0   ;;  %s735_s15 = smov 0  }
   0x2   :  { %s737_s16 = smov 0  }
   0x3 LB: > { %s25_s17 = sadd.s32 1, %s702_s15  ;;  %s579_s18 = sadd.s32 4294967295, %s706_s16   ;;  %s706_s16 = sphi %s737_s16, %s13_s16   ;;  %s702_s15 = sphi %s735_s15, %s831_s15   ;;  %s698_s14 = sphi %s733_s14, %s830_s14   ;;  %s694_s13 = sphi %s731_s13, %s829_s13   ;;  %s690_s12 = sphi %s729_s12, %s828_s12  }
   0x4   : > { %p27_p0 = scmp.ge.s32.totalorder %s25_s17, 2  ;;  %p88_p1 = scmp.ne.s32.totalorder %s694_s13, %s690_s12 }
   0x5   : > { %p89_p2 = scmp.eq.s32.totalorder %s706_s16, 0  ;;  %p118_p4 = scmp.eq.s32.totalorder %s579_s18, 1 }
   0x6   : > { %s833_s17 = smov (%p27_p0, %s25_s17), 0  ;;  %s81_s20 = sadd.s32 1, %s694_s13 }
   0x7   : > { %p90_p3 = por %p89_p2, %p88_p1  ;;  %s77_s19 = ssub.s32 %s702_s15, %s833_s17 }
   0x8   : > { %p79_p5 = scmp.eq.s32.totalorder %s77_s19, 0  ;;  %p764_p6 = por %p118_p4, %p88_p1 }
   0x9   : > { %p583_p7 = scmp.ge.s32.totalorder %s706_s16, 2 }
   0xa   : > { %s769_s22 = scalar_select %p79_p5, %s694_s13, %s81_s20  }
   0xb   : > { %150 = sbr.rel (%p583_p7) target bundleno = 25 (0x19), region = 24 }
  0x12   : > { %153 = sbr.rel (!%p90_p3) target bundleno = 25 (0x19), region = 28  ;;  %s155_s23 = sand.u32 (%p90_p3), 1, %s694_s13  }
  0x13   : > { %s603_s24 = sshll.u32 (%p90_p3), %s702_s15, 3  ;;  %s611_s25 = smul.u32 (%p90_p3), 48, %s155_s23 }
  0x14   : > { %s163_s28 = scalar_lea.vmem (%p90_p3), %s825_s2, %s603_s24 }
  0x15   : > { %v201_v0 = vld [vmem:[%s163_s28] sm:$0xff] (%p90_p3)  ;;  %v203_v1 = vld [vmem:[%s163_s28 + $0x10] sm:$0xff] (%p90_p3)  ;;  %s157_s29 = scalar_lea.vmem (%p90_p3), [#allocation2], %s611_s25 }
  0x16   : > { %v205_v2 = vld [vmem:[%s163_s28 + $0x20] sm:$0xff] (%p90_p3)  ;;  %v207_v3 = vld [vmem:[%s163_s28 + $0x30] sm:$0xff] (%p90_p3)  ;;  %202 = vst [vmem:[%s157_s29] sm:$0xff] (%p90_p3), %v201_v0  ;;  %204 = vst [vmem:[%s157_s29 + $0x8] sm:$0xff] (%p90_p3), %v203_v1 }
  0x17   : > { %v209_v4 = vld [vmem:[%s163_s28 + $0x40] sm:$0xff] (%p90_p3)  ;;  %v211_v5 = vld [vmem:[%s163_s28 + $0x50] sm:$0xff] (%p90_p3)  ;;  %206 = vst [vmem:[%s157_s29 + $0x10] sm:$0xff] (%p90_p3), %v205_v2  ;;  %208 = vst [vmem:[%s157_s29 + $0x18] sm:$0xff] (%p90_p3), %v207_v3 }
  0x18   : > { %210 = vst [vmem:[%s157_s29 + $0x20] sm:$0xff] (%p90_p3), %v209_v4  ;;  %212 = vst [vmem:[%s157_s29 + $0x28] sm:$0xff] (%p90_p3), %v211_v5 }
  0x19 PF: > { %p586_p8 = scmp.ge.s32.totalorder %s706_s16, 1  ;;  %p217_p9 = scmp.lt.s32.totalorder %s706_s16, 3 }
  0x1b   : > { %p218_p10 = pnand %p586_p8, %p217_p9 }
  0x1c   : > { %s224_s30 = sand.u32 (!%p218_p10), 1, %s690_s12   ;;  %v708_v6 = vmov (!%p218_p10), 0   ;;  %v417_v7 = vld [vmem:[%s824_s1 + $0x10] sm:$0xff] (!%p218_p10)  ;;  %v415_v8 = vld [vmem:[%s824_s1] sm:$0xff] (!%p218_p10)  ;;  %v418_v10 = vld [vmem:[%s824_s1 + $0x18] sm:$0xff] (!%p218_p10)  ;;  %vm328_vm0 = vcmask (!%p218_p10), 392192  }
  0x1d   : > { %221 = sbr.rel (%p218_p10) target bundleno = 273 (0x111), region = 66  ;;  %367 = vmatprep.mubr.bf16.mxu0 (!%p218_p10), %v708_v6  ;;  %377 = vmatprep.mubr.bf16.mxu1 (!%p218_p10), %v708_v6  ;;  %v416_v13 = vld [vmem:[%s824_s1 + $0x8] sm:$0xff] (!%p218_p10)  ;;  %v666_v17 = vld [vmem:[%s823_s0] sm:$0xff] (!%p218_p10)   ;;  %s587_s26 = sshll.u32 (!%p218_p10), %s224_s30, 6 }
  0x1e   : > { %s612_s4 = smul.u32 (!%p218_p10), 48, %s224_s30  ;;  %656 = vset.pattern.permute.xlu1 (!%p218_p10), %v708_v6  ;;  %655 = vset.pattern.permute.xlu0 (!%p218_p10), %v708_v6  ;;  %v667_v18 = vld [vmem:[%s823_s0 + $0x8] sm:$0xff] (!%p218_p10)   ;;  %s249_s27 = scalar_lea.vmem (!%p218_p10), [#allocation3], %s587_s26 }
  0x1f   : > { %431 = vperm.xlu1 (!%p218_p10), %656, %v417_v7   ;;  %421 = vperm.xlu0 (!%p218_p10), %655, %v415_v8  }
  0x20   : > { %s226_s9 = scalar_lea.vmem (!%p218_p10), [#allocation2], %s612_s4 }
  0x21   : > { %v657_v9 = vld [vmem:[%s226_s9 + $0x4] ss:$8 sps:$4 sm:$0xff] (!%p218_p10)   ;;  %v659_v11 = vld [vmem:[%s226_s9] ss:$8 sps:$4 sm:$0xff] (!%p218_p10)   ;;  %v660_v12 = vld [vmem:[%s226_s9 + $0x14] ss:$8 sps:$4 sm:$0xff] (!%p218_p10)  }
  0x22   : > { %335 = vmatprep.subr.bf16.mxu0 (!%p218_p10), %v657_v9  ;;  %605 = vmatprep.subr.bf16.mxu1 (!%p218_p10), %v657_v9  ;;  %v662_v14 = vld [vmem:[%s226_s9 + $0x10] ss:$8 sps:$4 sm:$0xff] (!%p218_p10)   ;;  %v663_v15 = vld [vmem:[%s226_s9 + $0x24] ss:$8 sps:$4 sm:$0xff] (!%p218_p10)   ;;  %v665_v16 = vld [vmem:[%s226_s9 + $0x20] ss:$8 sps:$4 sm:$0xff] (!%p218_p10)  }
  0x23   : > { %336 = vmatpush1.bf16.msra.mxu0 (!%p218_p10), %v659_v11  ;;  %608 = vmatpush1.bf16.msra.mxu1 (!%p218_p10), %v659_v11 }
  0x24   : > { %337 = vmatprep.subr.bf16.mxu0 %v660_v12  ;;  %606 = vmatprep.subr.bf16.mxu1 %v660_v12  ;;  %s604_s12 = sshll.u32 (%p764_p6), %s698_s14, 4 }
  0x25   : > { %436 = vperm.xlu1 %656, %v418_v10   ;;  %426 = vperm.xlu0 %655, %v416_v13   ;;  %s464_s30 = scalar_lea.vmem (%p764_p6), %s826_s3, %s604_s12 }
  0x27   : > { %338 = vmatpush1.bf16.msra.mxu0 %v662_v14  ;;  %609 = vmatpush1.bf16.msra.mxu1 %v662_v14 }
  0x28   : > { %339 = vmatprep.subr.bf16.mxu0 %v663_v15  ;;  %607 = vmatprep.subr.bf16.mxu1 %v663_v15 }
  0x2b   : > { %340 = vmatpush1.bf16.msra.mxu0 %v665_v16  ;;  %610 = vmatpush1.bf16.msra.mxu1 %v665_v16 }
  0x2e   : > { %596 = vmatmul.mubr.msk.bf16.vlgmr.msra.gmra.mrb[0].mxu0 %vm328_vm0, %v666_v17  ;;  %597 = vmatmul.mubr.msk.bf16.vlgmr.msra.gmra.mrb[0].mxu1 %vm328_vm0, %v667_v18 }
  0x9e   : > { %v432_v19 = vpop.permute.xlu1 %431  ;;  %v422_v20 = vpop.permute.xlu0 %421 }
  0xa4   : > { %v437_v33 = vpop.permute.xlu1 %436  ;;  %v427_v34 = vpop.permute.xlu0 %426 }
 0x101   : > { %v369_v21 = vpop.f32.mrb[0].mxu0  ;;  %v379_v22 = vpop.f32.mrb[0].mxu1  ;;  %461 = sbr.rel (!%p764_p6) target bundleno = 273 (0x111), region = 82 }
 0x102   : > { %v371_v23 = vpop.f32.mrb[1].mxu0  ;;  %v381_v24 = vpop.f32.mrb[1].mxu1  ;;  %v443_v29 = vadd.f32 %v432_v19, %v379_v22  ;;  %v439_v30 = vadd.f32 %v422_v20, %v369_v21 }
 0x103   : > { %v373_v25 = vpop.f32.mrb[2].mxu0  ;;  %v383_v26 = vpop.f32.mrb[2].mxu1  ;;  %v444_v31 = vadd.f32 %v432_v19, %v381_v24  ;;  %v440_v32 = vadd.f32 %v422_v20, %v371_v23 }
 0x104   : > { %v375_v27 = vpop.f32.mrb[3].mxu0  ;;  %v385_v28 = vpop.f32.mrb[3].mxu1  ;;  %451 = vst [vmem:[%s249_s27 + $0x20] sm:$0xff] %v443_v29  ;;  %447 = vst [vmem:[%s249_s27] sm:$0xff] %v439_v30  ;;  %v445_v35 = vadd.f32 %v437_v33, %v383_v26  ;;  %v441_v36 = vadd.f32 %v427_v34, %v373_v25 }
 0x105   : > { %452 = vst [vmem:[%s249_s27 + $0x28] sm:$0xff] %v444_v31  ;;  %448 = vst [vmem:[%s249_s27 + $0x8] sm:$0xff] %v440_v32  ;;  %v446_v37 = vadd.f32 %v437_v33, %v385_v28  ;;  %v442_v38 = vadd.f32 %v427_v34, %v375_v27 }
 0x106   : > { %453 = vst [vmem:[%s249_s27 + $0x30] sm:$0xff] %v445_v35  ;;  %449 = vst [vmem:[%s249_s27 + $0x10] sm:$0xff] %v441_v36 }
 0x107   : > { %454 = vst [vmem:[%s249_s27 + $0x38] sm:$0xff] %v446_v37  ;;  %450 = vst [vmem:[%s249_s27 + $0x18] sm:$0xff] %v442_v38 }
 0x10b   : > { %v477_v39 = vld [vmem:[%s249_s27] sm:$0xff] }
 0x10c   : > { %v479_v40 = vld [vmem:[%s249_s27 + $0x8] sm:$0xff]  ;;  %v485_v43 = vld [vmem:[%s249_s27 + $0x20] sm:$0xff]  ;;  %478 = vst [vmem:[%s464_s30] sm:$0xff] %v477_v39 }
 0x10d   : > { %v481_v41 = vld [vmem:[%s249_s27 + $0x10] sm:$0xff]  ;;  %v487_v44 = vld [vmem:[%s249_s27 + $0x28] sm:$0xff]  ;;  %480 = vst [vmem:[%s464_s30 + $0x8] sm:$0xff] %v479_v40  ;;  %486 = vst [vmem:[%s464_s30 + $0x40] sm:$0xff] %v485_v43 }
 0x10e   : > { %v483_v42 = vld [vmem:[%s249_s27 + $0x18] sm:$0xff]  ;;  %482 = vst [vmem:[%s464_s30 + $0x20] sm:$0xff] %v481_v41  ;;  %488 = vst [vmem:[%s464_s30 + $0x48] sm:$0xff] %v487_v44  ;;  %v489_v45 = vld [vmem:[%s249_s27 + $0x30] sm:$0xff] }
 0x10f   : > { %484 = vst [vmem:[%s464_s30 + $0x28] sm:$0xff] %v483_v42  ;;  %v491_v46 = vld [vmem:[%s249_s27 + $0x38] sm:$0xff]  ;;  %490 = vst [vmem:[%s464_s30 + $0x60] sm:$0xff] %v489_v45 }
 0x110   : > { %492 = vst [vmem:[%s464_s30 + $0x68] sm:$0xff] %v491_v46 }
 0x111 PF: > { %s13_s16 = sadd.s32 1, %s706_s16   ;;  %s828_s12 = smov %s694_s13 }
 0x112   : > { %p10_p11 = scmp.ge.s32.totalorder %s13_s16, 4   ;;  %s829_s13 = smov %s769_s22 }
 0x113   : > { %s830_s14 = smov %s702_s15  ;;  %s831_s15 = smov %s833_s17 }
 0x114   :  { %12 = sbr.rel (!%p10_p11) target bundleno = 3 (0x3), region = 139 }

// kernel: deformable_conv2d_forward.3
= control target key start
LH: loop header
LB: loop body
LE: loop exit
PB: predicated region body
PF: predicated region fallthrough
CT: control target
= control target key end

     0   :  { %s1822_s0 = inlined_call_operand.vmem [shape: bf16[9,16,16], index: 0, kind: input, shape index: {}]   ;;  %s1823_s1 = inlined_call_operand.vmem [shape: f32[16,1], index: 1, kind: input, shape index: {}]   ;;  %s1824_s2 = inlined_call_operand.vmem [shape: bf16[9,16,512], index: 2, kind: input, shape index: {}]   ;;  %s1825_s3 = inlined_call_operand.vmem [shape: bf16[9,16,512], index: 3, kind: input, shape index: {}]   ;;  %s1826_s4 = inlined_call_operand.vmem [shape: bf16[9,16,512], index: 4, kind: input, shape index: {}]   ;;  %s1827_s5 = inlined_call_operand.vmem [shape: bf16[9,16,512], index: 5, kind: input, shape index: {}]   ;;  %s1828_s6 = inlined_call_operand.vmem [shape: bf16[9,1,512], index: 6, kind: input, shape index: {}]   ;;  %s1829_s7 = inlined_call_operand.vmem [shape: bf16[9,1,512], index: 7, kind: input, shape index: {}]   ;;  %s1830_s8 = inlined_call_operand.vmem [shape: bf16[9,1,512], index: 8, kind: input, shape index: {}]   ;;  %s1831_s9 = inlined_call_operand.vmem [shape: bf16[9,1,512], index: 9, kind: input, shape index: {}]   ;;  %s1832_s10 = inlined_call_operand.vmem [shape: f32[16,512], index: 10, kind: output, shape index: {}]  }
   0x1   :  { %1837 = sst [smem:[#allocation13_spill]] %s1822_s0 }
   0x2   :  { %1838 = sst [smem:[#allocation14_spill]] %s1824_s2 }
   0x3   :  { %1839 = sst [smem:[#allocation15_spill]] %s1825_s3 }
   0x4   :  { %1840 = sst [smem:[#allocation16_spill]] %s1826_s4 }
   0x5   :  { %1841 = sst [smem:[#allocation17_spill]] %s1832_s10 }
   0x6   :  { %s1591_s13 = smov 0   ;;  %s1593_s14 = smov 0  }
   0x7   :  { %s1595_s15 = smov 0   ;;  %s1597_s16 = smov 0  }
   0x8   :  { %s1599_s17 = smov 0   ;;  %s1601_s18 = smov 0  }
   0x9   :  { %s1603_s19 = smov 0   ;;  %s1605_s20 = smov 0  }
   0xa   :  { %s1607_s21 = smov 0  }
   0xb LB: > { %1842 = sst [smem:[#allocation7_spill]] %s1502_s14  ;;  %s29_s22 = sadd.s32 1, %s1522_s19  ;;  %s1530_s21 = sphi %s1607_s21, %s20_s21   ;;  %s1526_s20 = sphi %s1605_s20, %s1866_s20   ;;  %s1522_s19 = sphi %s1603_s19, %s1865_s19   ;;  %s1518_s18 = sphi %s1601_s18, %s1864_s18   ;;  %s1514_s17 = sphi %s1599_s17, %s1863_s17   ;;  %s1510_s16 = sphi %s1597_s16, %s1862_s16   ;;  %s1506_s15 = sphi %s1595_s15, %s1861_s15   ;;  %s1502_s14 = sphi %s1593_s14, %s1857_s14   ;;  %s1498_s13 = sphi %s1591_s13, %s1856_s13  }
   0xc   : > { %p30_p0 = scmp.ge.s32.totalorder %s29_s22, 9  ;;  %s32_s23 = sadd.s32 1, %s1526_s20 }
   0xd   : > { %p95_p1 = scmp.ne.s32.totalorder %s1510_s16, %s1506_s15  ;;  %s1311_s24 = sadd.s32 4294967295, %s1530_s21  }
   0xe   : > { %s1868_s22 = smov (%p30_p0, %s29_s22), 0  ;;  %s1870_s23 = smov (!%p30_p0, %s32_s23), %s1526_s20 }
   0xf   : > { %1843 = sst [smem:[#allocation8_spill]] %s1868_s22  ;;  %p96_p2 = scmp.eq.s32.totalorder %s1530_s21, 0 }
  0x10   : > { %p34_p3 = scmp.ge.s32.totalorder %s1870_s23, 2  ;;  %s83_s25 = ssub.s32 %s1522_s19, %s1868_s22 }
  0x11   : > { %p1647_p4 = por %p96_p2, %p95_p1  ;;  %p320_p5 = scmp.ne.s32.totalorder %s1502_s14, %s1498_s13 }
  0x12   : > { %s1872_s23 = smov (%p34_p3, %s1870_s23), 0  ;;  %s88_s27 = sadd.s32 1, %s1510_s16 }
  0x13   : > { %1845 = sst [smem:[#allocation9_spill]] %s1872_s23  ;;  %p321_p6 = scmp.eq.s32.totalorder %s1311_s24, 17 }
  0x14   : > { %s84_s28 = ssub.s32 %s1526_s20, %s1872_s23  ;;  %s310_s29 = sadd.s32 1, %s1502_s14 }
  0x15   : > { %s85_s30 = sor.u32 %s84_s28, %s83_s25  ;;  %p308_p7 = scmp.eq.s32.totalorder %s84_s28, 0 }
  0x16   : > { %p86_p8 = scmp.eq.s32.totalorder %s85_s30, 0  ;;  %p1659_p9 = por %p321_p6, %p320_p5 }
  0x17   : > { %s1664_s12 = scalar_select %p308_p7, %s1502_s14, %s310_s29  }
  0x18   : > { %s1846_s11 = scalar_select %p1659_p9, 1, 0 }
  0x19   : > { %1848 = sst [smem:[#allocation11_spill]] %s1664_s12  ;;  %p1314_p10 = scmp.ge.s32.totalorder %s1530_s21, 18 }
  0x1a   : > { %1847 = sst [smem:[#allocation10_spill]] %s1846_s11 }
  0x1b   : > { %s1667_s22 = scalar_select %p86_p8, %s1510_s16, %s88_s27  }
  0x1c   : > { %346 = sbr.rel (%p1314_p10) target bundleno = 76 (0x4c), region = 20 }
  0x1d   : > { %1849 = sst [smem:[#allocation12_spill]] %s1667_s22 }
  0x23   : > { %357 = sbr.rel (!%p1647_p4) target bundleno = 46 (0x2e), region = 28  ;;  %s359_s24 = sand.u32 (%p1647_p4), 1, %s1510_s16  }
  0x24   : > { %s1316_s25 = sshll.u32 (%p1647_p4), %s1526_s20, 1  ;;  %s1315_s28 = sshll.u32 (%p1647_p4), %s359_s24, 4 }
  0x25   : > { %s1317_s30 = sshll.u32 (%p1647_p4), %s1522_s19, 3  ;;  %s1850_s2 = sld [smem:[#allocation14_spill]] (%p1647_p4) }
  0x26   : > { %s364_s23 = sadd.s32 (%p1647_p4), %s1317_s30, %s1316_s25  ;;  %s361_s22 = scalar_lea.vmem (%p1647_p4), [#allocation2], %s1315_s28 }
  0x27   : > { %s1318_s10 = sshll.u32 (%p1647_p4), %s364_s23, 2 }
  0x2b   : > { %s366_s27 = scalar_lea.vmem %s1850_s2, %s1318_s10 }
  0x2c   : > { %v396_v0 = vld [vmem:[%s366_s27] sm:$0xff]  ;;  %v398_v1 = vld [vmem:[%s366_s27 + $0x10] sm:$0xff] }
  0x2d   : > { %397 = vst [vmem:[%s361_s22] sm:$0xff] %v396_v0  ;;  %399 = vst [vmem:[%s361_s22 + $0x8] sm:$0xff] %v398_v1 }
  0x2e PF: > { %405 = sbr.rel (!%p1647_p4) target bundleno = 57 (0x39), region = 66  ;;  %s407_s24 = sand.u32 (%p1647_p4), 1, %s1510_s16  }
  0x2f   : > { %s1320_s12 = sshll.u32 (%p1647_p4), %s1526_s20, 1  ;;  %s1319_s25 = sshll.u32 (%p1647_p4), %s407_s24, 4 }
  0x30   : > { %s1321_s23 = sshll.u32 (%p1647_p4), %s1522_s19, 3  ;;  %s1851_s3 = sld [smem:[#allocation15_spill]] (%p1647_p4) }
  0x31   : > { %s412_s30 = sadd.s32 (%p1647_p4), %s1321_s23, %s1320_s12  ;;  %s409_s22 = scalar_lea.vmem (%p1647_p4), [#allocation3], %s1319_s25 }
  0x32   : > { %s1322_s14 = sshll.u32 (%p1647_p4), %s412_s30, 2 }
  0x36   : > { %s414_s29 = scalar_lea.vmem %s1851_s3, %s1322_s14 }
  0x37   : > { %v444_v2 = vld [vmem:[%s414_s29] sm:$0xff]  ;;  %v446_v3 = vld [vmem:[%s414_s29 + $0x10] sm:$0xff] }
  0x38   : > { %445 = vst [vmem:[%s409_s22] sm:$0xff] %v444_v2  ;;  %447 = vst [vmem:[%s409_s22 + $0x8] sm:$0xff] %v446_v3 }
  0x39 PF: > { %453 = sbr.rel (!%p1647_p4) target bundleno = 68 (0x44), region = 104  ;;  %s455_s28 = sand.u32 (%p1647_p4), 1, %s1510_s16  }
  0x3a   : > { %s1324_s27 = sshll.u32 (%p1647_p4), %s1526_s20, 1  ;;  %s1323_s12 = sshll.u32 (%p1647_p4), %s455_s28, 4 }
  0x3b   : > { %s1325_s24 = sshll.u32 (%p1647_p4), %s1522_s19, 3  ;;  %s1852_s4 = sld [smem:[#allocation16_spill]] (%p1647_p4) }
  0x3c   : > { %s460_s23 = sadd.s32 (%p1647_p4), %s1325_s24, %s1324_s27  ;;  %s457_s25 = scalar_lea.vmem (%p1647_p4), [#allocation4], %s1323_s12 }
  0x3d   : > { %s1326_s30 = sshll.u32 (%p1647_p4), %s460_s23, 2 }
  0x41   : > { %s462_s10 = scalar_lea.vmem %s1852_s4, %s1326_s30 }
  0x42   : > { %v492_v4 = vld [vmem:[%s462_s10] sm:$0xff]  ;;  %v494_v5 = vld [vmem:[%s462_s10 + $0x10] sm:$0xff] }
  0x43   : > { %493 = vst [vmem:[%s457_s25] sm:$0xff] %v492_v4  ;;  %495 = vst [vmem:[%s457_s25 + $0x8] sm:$0xff] %v494_v5 }
  0x44 PF: > { %501 = sbr.rel (!%p1647_p4) target bundleno = 76 (0x4c), region = 142  ;;  %s503_s29 = sand.u32 (%p1647_p4), 1, %s1510_s16  }
  0x45   : > { %s1328_s22 = sshll.u32 (%p1647_p4), %s1526_s20, 1  ;;  %s1327_s28 = sshll.u32 (%p1647_p4), %s503_s29, 4 }
  0x46   : > { %s1329_s27 = sshll.u32 (%p1647_p4), %s1522_s19, 3  ;;  %s505_s12 = scalar_lea.vmem (%p1647_p4), [#allocation5], %s1327_s28 }
  0x47   : > { %s508_s24 = sadd.s32 (%p1647_p4), %s1329_s27, %s1328_s22 }
  0x48   : > { %s1330_s23 = sshll.u32 (%p1647_p4), %s508_s24, 2 }
  0x49   : > { %s510_s14 = scalar_lea.vmem (%p1647_p4), %s1827_s5, %s1330_s23 }
  0x4a   : > { %v540_v6 = vld [vmem:[%s510_s14] sm:$0xff] (%p1647_p4)  ;;  %v542_v7 = vld [vmem:[%s510_s14 + $0x10] sm:$0xff] (%p1647_p4) }
  0x4b   : > { %541 = vst [vmem:[%s505_s12] sm:$0xff] %v540_v6  ;;  %543 = vst [vmem:[%s505_s12 + $0x8] sm:$0xff] %v542_v7 }
  0x4c PF: > { %p1331_p11 = scmp.ge.s32.totalorder %s1530_s21, 1  ;;  %p596_p12 = scmp.lt.s32.totalorder %s1530_s21, 19 }
  0x4e   : > { %p597_p13 = pnand %p1331_p11, %p596_p12 }
  0x4f   : > { %s603_s26 = sand.u32 (!%p597_p13), 1, %s1506_s15   ;;  %s706_s10 = sand.u32 (!%p597_p13), 1, %s1498_s13  }
  0x50   : > { %600 = sbr.rel (%p597_p13) target bundleno = 358 (0x166), region = 196  ;;  %s1706_s25 = sshll.u32 (!%p597_p13), %s603_s26, 4 }
  0x51   : > { %s1336_s29 = sshll.u32 (!%p597_p13), %s706_s10, 5  ;;  %p709_p0 = scmp.lt.s32.totalorder (!%p597_p13), %s1514_s17, 8 }
  0x52   : > { %s1339_s22 = sshll.u32 (!%p597_p13), %s1518_s18, 1  ;;  %s1853_s0 = sld [smem:[#allocation13_spill]] (!%p597_p13) }
  0x53   : > { %p721_p1 = scmp.lt.s32.totalorder (!%p597_p13), %s1339_s22, 3  ;;  %s619_s4 = scalar_lea.vmem (!%p597_p13), [#allocation4], %s1706_s25 }
  0x54   : > { %s626_s15 = scalar_lea.vmem (!%p597_p13), [#allocation5], %s1706_s25  ;;  %s1738_s14 = scalar_lea.vmem (!%p597_p13), [#allocation6], %s1336_s29 }
  0x55   : > { %p1347_p2 = scmp.ne.s32.totalorder (!%p597_p13), %s1514_s17, 0 }
  0x57   : > { %s710_s28 = scalar_select %p709_p0, %s1514_s17, 8 }
  0x58   : > { %s1874_s22 = smov (!%p721_p1, %s1339_s22), 3  ;;  %759 = sbr.rel (%p1347_p2) target bundleno = 95 (0x5f), region = 216 }
  0x59   : > { %s1368_s27 = sshll.u32 %s710_s28, 3  ;;  %s1340_s30 = sshll.u32 %s710_s28, 2  ;;  %v1532_v8 = vmov (!%p1347_p2), 0.0  }
  0x5a   : > { %s1714_s11 = scalar_lea.vmem %s1853_s0, %s1368_s27  ;;  %s1716_s13 = sadd.s32 %s1340_s30, %s1874_s22  ;;  %760 = vst [vmem:[%s1738_s14] sm:$0xff] (!%p1347_p2), %v1532_v8  ;;  %761 = vst [vmem:[%s1738_s14 + $0x8] sm:$0xff] (!%p1347_p2), %v1532_v8 }
  0x5b   : > { %s725_s12 = scalar_lea.vmem %s1828_s6, %s1716_s13  ;;  %s734_s2 = scalar_lea.vmem %s1829_s7, %s1716_s13  ;;  %762 = vst [vmem:[%s1738_s14 + $0x10] sm:$0xff] (!%p1347_p2), %v1532_v8  ;;  %763 = vst [vmem:[%s1738_s14 + $0x18] sm:$0xff] (!%p1347_p2), %v1532_v8 }
  0x5c   : > { %s743_s27 = scalar_lea.vmem %s1830_s8, %s1716_s13  ;;  %s752_s22 = scalar_lea.vmem %s1831_s9, %s1716_s13 }
  0x5d   : > { %s605_s30 = scalar_lea.vmem [#allocation2], %s1706_s25  ;;  %s612_s0 = scalar_lea.vmem [#allocation3], %s1706_s25 }
  0x5f PF: > { %v1348_v9 = vld.sshfl [vmem:[%s725_s12] sm:$0x11 pattern:$0x75316420]  ;;  %v779_v10 = vlaneseq  ;;  %v1533_v11 = vmov 1966171168  }
  0x60   : > { %v777_v12 = vunpack.c.l.s4 %v1533_v11  ;;  %v1351_v14 = vld.sshfl [vmem:[%s734_s2] sm:$0x11 pattern:$0x75316420]  ;;  %v775_v15 = vcombine.high %v1348_v9, %v1348_v9  ;;  %v1534_v21 = vmov 0   ;;  %vm989_vm0 = vcmask 130048  }
  0x61   : > { %v780_v13 = vshrl.u32 %v779_v10, 7  ;;  %v1354_v16 = vld.sshfl [vmem:[%s743_s27] sm:$0x11 pattern:$0x75316420]  ;;  %v827_v18 = vcombine.high %v1351_v14, %v1351_v14  ;;  %1025 = vmatprep.mubr.bf16.mxu0 %v1534_v21  ;;  %p1362_p3 = scmp.ne.s32.totalorder %s1514_s17, 8 }
  0x62   : > { %v778_v17 = vunpack.c.0.s8 %v777_v12  ;;  %v881_v19 = vcombine.high %v1354_v16, %v1354_v16  ;;  %v1357_v20 = vld.sshfl [vmem:[%s752_s22] sm:$0x11 pattern:$0x75316420]  ;;  %v1446_v34 = vld [vmem:[%s605_s30 + $0x4] ss:$8 sps:$4 sm:$0xff]  }
  0x63   : > { %v935_v23 = vcombine.high %v1357_v20, %v1357_v20  ;;  %v795_v24 = vsub.s32 0, %v780_v13  ;;  %v1448_v36 = vld [vmem:[%s612_s0 + $0x4] ss:$8 sps:$4 sm:$0xff]   ;;  %v1454_v41 = vld [vmem:[%s605_s30] ss:$8 sps:$4 sm:$0xff]   ;;  %v1535_v21 = vmov (!%p1362_p3), 0  }
  0x64   : > { %v781_v22 = vsub.s32 %v778_v17, %v780_v13  ;;  %v1450_v38 = vld [vmem:[%s619_s4 + $0x4] ss:$8 sps:$4 sm:$0xff]   ;;  %v1455_v43 = vld [vmem:[%s612_s0] ss:$8 sps:$4 sm:$0xff]   ;;  %1459 = vset.pattern.permute.xlu0 (!%p1362_p3), %v1535_v21 }
  0x65   : > { %v1456_v45 = vld [vmem:[%s619_s4] ss:$8 sps:$4 sm:$0xff]   ;;  %v1452_v51 = vld [vmem:[%s626_s15 + $0x4] ss:$8 sps:$4 sm:$0xff]  }
  0x66   : > { %v789_v25 = vrot.slane %v775_v15, %v781_v22  ;;  %v841_v26 = vrot.slane %v827_v18, %v781_v22  ;;  %v895_v27 = vrot.slane %v881_v19, %v781_v22  ;;  %v949_v28 = vrot.slane %v935_v23, %v781_v22  ;;  %v1457_v56 = vld [vmem:[%s626_s15] ss:$8 sps:$4 sm:$0xff]  }
  0x67   : > { %v782_v29 = vrot.slane %v1348_v9, %v781_v22  ;;  %v834_v30 = vrot.slane %v1351_v14, %v781_v22  ;;  %v888_v31 = vrot.slane %v1354_v16, %v781_v22  ;;  %v942_v32 = vrot.slane %v1357_v20, %v781_v22  ;;  %v1458_v7 = vld [vmem:[%s1714_s11] sm:$0xff]   ;;  %v979_v9 = vld [vmem:[%s1738_s14 + $0x8] sm:$0xff]  ;;  %v980_v11 = vld [vmem:[%s1738_s14 + $0x10] sm:$0xff] }
  0x68   : > { %v798_v33 = vpack.i.b16 %v789_v25, %v789_v25  ;;  %v850_v35 = vpack.i.b16 %v841_v26, %v841_v26  ;;  %v904_v37 = vpack.i.b16 %v895_v27, %v895_v27  ;;  %v958_v39 = vpack.i.b16 %v949_v28, %v949_v28  ;;  %v978_v8 = vld [vmem:[%s1738_s14] sm:$0xff]  ;;  %v981_v14 = vld [vmem:[%s1738_s14 + $0x18] sm:$0xff]  ;;  %v1053_v22 = vld [vmem:[%s1823_s1 + $0x8] sm:$0xff] (!%p1362_p3) }
  0x69   : > { %v791_v40 = vpack.i.b16 %v782_v29, %v782_v29  ;;  %v843_v42 = vpack.i.b16 %v834_v30, %v834_v30  ;;  %v897_v44 = vpack.i.b16 %v888_v31, %v888_v31  ;;  %v951_v46 = vpack.i.b16 %v942_v32, %v942_v32  ;;  %v1052_v20 = vld [vmem:[%s1823_s1] sm:$0xff] (!%p1362_p3) }
  0x6a   : > { %v803_v47 = vrot.slane %v798_v33, %v795_v24  ;;  %v855_v48 = vrot.slane %v850_v35, %v795_v24  ;;  %v909_v49 = vrot.slane %v904_v37, %v795_v24  ;;  %v963_v50 = vrot.slane %v958_v39, %v795_v24  ;;  %1056 = vperm.xlu0 (!%p1362_p3), %1459, %v1052_v20  }
  0x6b   : > { %v796_v52 = vrot.slane %v791_v40, %v795_v24  ;;  %v848_v53 = vrot.slane %v843_v42, %v795_v24  ;;  %v902_v54 = vrot.slane %v897_v44, %v795_v24  ;;  %v956_v55 = vrot.slane %v951_v46, %v795_v24 }
  0x6c   : > { %v815_v57 = vmul.bf16 %v1446_v34, %v803_v47  ;;  %v867_v58 = vmul.bf16 %v1448_v36, %v855_v48  ;;  %v921_v59 = vmul.bf16 %v1450_v38, %v909_v49  ;;  %v975_v0 = vmul.bf16 %v1452_v51, %v963_v50 }
  0x6d   : > { %v814_v60 = vmul.bf16 %v1454_v41, %v796_v52  ;;  %v866_v61 = vmul.bf16 %v1455_v43, %v848_v53  ;;  %v920_v62 = vmul.bf16 %v1456_v45, %v902_v54  ;;  %v974_v2 = vmul.bf16 %v1457_v56, %v956_v55 }
  0x6e   : > { %v869_v63 = vadd.bf16 %v867_v58, %v815_v57  ;;  %1061 = vperm.xlu0 (!%p1362_p3), %1459, %v1053_v22  }
  0x6f   : > { %v868_v1 = vadd.bf16 %v866_v61, %v814_v60 }
  0x70   : > { %v923_v3 = vadd.bf16 %v921_v59, %v869_v63 }
  0x71   : > { %v922_v4 = vadd.bf16 %v920_v62, %v868_v1 }
  0x72   : > { %v977_v5 = vadd.bf16 %v975_v0, %v923_v3 }
  0x73   : > { %v976_v6 = vadd.bf16 %v974_v2, %v922_v4 }
  0x74   : > { %993 = vmatprep.subr.bf16.mxu0 %v977_v5 }
  0x75   : > { %994 = vmatpush1.bf16.msra.mxu0 %v976_v6 }
  0x78   : > { %1361 = vmatmul.mubr.msk.bf16.vlgmr.msra.gmra.mrb[0].mxu0 %vm989_vm0, %v1458_v7 }
  0xe9   : > { %v1057_v25 = vpop.permute.xlu0 (!%p1362_p3), %1056 }
  0xed   : > { %v1062_v30 = vpop.permute.xlu0 (!%p1362_p3), %1061 }
 0x14b   : > { %v1027_v10 = vpop.f32.mrb[0].mxu0  ;;  %1047 = sbr.rel (%p1362_p3) target bundleno = 348 (0x15c), region = 220 }
 0x14c   : > { %v1036_v12 = vadd.f32 %v1027_v10, %v978_v8  ;;  %v1029_v13 = vpop.f32.mrb[1].mxu0 }
 0x14d   : > { %v1037_v15 = vadd.f32 %v1029_v13, %v979_v9  ;;  %v1031_v16 = vpop.f32.mrb[2].mxu0 }
 0x14e   : > { %1040 = vst [vmem:[%s1738_s14] sm:$0xff] %v1036_v12  ;;  %v1038_v17 = vadd.f32 %v1031_v16, %v980_v11  ;;  %v1033_v18 = vpop.f32.mrb[3].mxu0 }
 0x14f   : > { %1041 = vst [vmem:[%s1738_s14 + $0x8] sm:$0xff] %v1037_v15  ;;  %v1039_v19 = vadd.f32 %v1033_v18, %v981_v14 }
 0x150   : > { %1042 = vst [vmem:[%s1738_s14 + $0x10] sm:$0xff] %v1038_v17 }
 0x151   : > { %1043 = vst [vmem:[%s1738_s14 + $0x18] sm:$0xff] %v1039_v19 }
 0x155   : > { %v1048_v23 = vld [vmem:[%s1738_s14] sm:$0xff] }
 0x156   : > { %v1049_v24 = vld [vmem:[%s1738_s14 + $0x8] sm:$0xff]  ;;  %v1064_v26 = vadd.f32 %v1057_v25, %v1048_v23 }
 0x157   : > { %v1065_v27 = vadd.f32 %v1057_v25, %v1049_v24  ;;  %v1050_v28 = vld [vmem:[%s1738_s14 + $0x10] sm:$0xff] }
 0x158   : > { %v1051_v29 = vld [vmem:[%s1738_s14 + $0x18] sm:$0xff]  ;;  %1068 = vst [vmem:[%s1738_s14] sm:$0xff] %v1064_v26  ;;  %v1066_v31 = vadd.f32 %v1062_v30, %v1050_v28 }
 0x159   : > { %1069 = vst [vmem:[%s1738_s14 + $0x8] sm:$0xff] %v1065_v27  ;;  %v1067_v32 = vadd.f32 %v1062_v30, %v1051_v29 }
 0x15a   : > { %1070 = vst [vmem:[%s1738_s14 + $0x10] sm:$0xff] %v1066_v31 }
 0x15b   : > { %1071 = vst [vmem:[%s1738_s14 + $0x18] sm:$0xff] %v1067_v32 }
 0x15c PF: > { %1078 = sbr.rel (!%p1659_p9) target bundleno = 358 (0x166), region = 224  ;;  %s1369_s25 = sshll.u32 (%p1659_p9), %s1518_s18, 4 }
 0x15d   : > { %s1855_s13 = sld [smem:[#allocation17_spill]] (%p1659_p9) }
 0x15f   : > { %v1094_v33 = vld [vmem:[%s1738_s14] sm:$0xff] (%p1659_p9) }
 0x160   : > { %v1096_v34 = vld [vmem:[%s1738_s14 + $0x8] sm:$0xff] (%p1659_p9) }
 0x161   : > { %v1098_v35 = vld [vmem:[%s1738_s14 + $0x10] sm:$0xff] (%p1659_p9) }
 0x162   : > { %v1100_v36 = vld [vmem:[%s1738_s14 + $0x18] sm:$0xff] (%p1659_p9) }
 0x163   : > { %s1081_s12 = scalar_lea.vmem %s1855_s13, %s1369_s25 }
 0x164   : > { %1095 = vst [vmem:[%s1081_s12] sm:$0xff] %v1094_v33  ;;  %1097 = vst [vmem:[%s1081_s12 + $0x8] sm:$0xff] %v1096_v34 }
 0x165   : > { %1099 = vst [vmem:[%s1081_s12 + $0x20] sm:$0xff] %v1098_v35  ;;  %1101 = vst [vmem:[%s1081_s12 + $0x28] sm:$0xff] %v1100_v36 }
 0x166 PF: > { %s20_s21 = sadd.s32 1, %s1530_s21   ;;  %s1856_s13 = sld [smem:[#allocation7_spill]] }
 0x167   : > { %p17_p4 = scmp.ge.s32.totalorder %s20_s21, 20   ;;  %s1857_s14 = sld [smem:[#allocation11_spill]] }
 0x168   : > { %s1858_s18 = sld [smem:[#allocation12_spill]]  ;;  %s1859_s26 = sld [smem:[#allocation8_spill]] }
 0x169   : > { %s1860_s10 = sld [smem:[#allocation9_spill]]  ;;  %s1861_s15 = smov %s1510_s16 }
 0x16a   : > { %s1863_s17 = smov %s1522_s19  ;;  %19 = sbr.rel (!%p17_p4) target bundleno = 11 (0xb), region = 317 }
 0x16e   : > { %s1862_s16 = smov %s1858_s18  ;;  %s1864_s18 = smov %s1526_s20 }
 0x16f   : > { %s1865_s19 = smov %s1859_s26  ;;  %s1866_s20 = smov %s1860_s10 }

</bundles_post_ra>
